<compile_context>
chip_gen: v7x
topology: tpu7x:2x2x1
jax: 0.10.0
libtpu: 0.0.40
codegen_flags: <defaults>
</compile_context>

<pallas_src>
import jax
import jax.numpy as jnp
from jax import lax
from jax.experimental import pallas as pl
from jax.experimental.pallas import tpu as pltpu


def _self_attn_kernel(params_ref, stats_ref, xq_ref, xkr_ref, xkc_ref,
                      o_ref, acc_ref):
    # params_ref (SMEM f32[7]):    [w_q, b_q, w_k, b_k, w_v, b_v, gamma]
    # stats_ref  (SMEM f32[2*B]):  per-batch [x_max, x_min] pairs
    # xq_ref  (VMEM (1, Tq)):      query-pixel tile of x (also the residual)
    # xkr_ref (VMEM (1, Tk)):      key/value pixel chunk of x, row layout
    # xkc_ref (VMEM (Tk, 1)):      same pixel chunk, column layout
    # o_ref   (VMEM (1, Tq)):      output tile (lane dense)
    # acc_ref (VMEM (2, Tq) f32):  [num ; den] accumulator across key chunks
    b = pl.program_id(0)
    kc = pl.program_id(2)
    last_kc = pl.num_programs(2) - 1

    wq = params_ref[0]
    bq = params_ref[1]
    wk = params_ref[2]
    bk = params_ref[3]
    wv = params_ref[4]
    bv = params_ref[5]
    gamma = params_ref[6]

    @pl.when(kc == 0)
    def _init():
        acc_ref[...] = jnp.zeros_like(acc_ref)

    x_q = xq_ref[...].astype(jnp.float32)          # (1, Tq)
    x_kr = xkr_ref[...].astype(jnp.float32)        # (1, Tk)
    x_kc = xkc_ref[...].astype(jnp.float32)        # (Tk, 1)

    # 1x1 convs (1 -> 1 channel) are per-pixel affine maps (pure VPU, O(T)).
    q = wq * x_q + bq                              # (1, Tq)  proj_query (row)
    k_col = wk * x_kc + bk                         # (Tk, 1)  proj_key (column)
    v_row = wv * x_kr + bv                         # (1, Tk)  proj_value (row)

    # Exact global row max of energy[i, :] = q_i * k without any N^2 reduce:
    #   max_j q_i*k_j = q_i*kmax if q_i >= 0 else q_i*kmin,
    # with kmax/kmin derived from the per-batch global x extremes in SMEM.
    x_mx = stats_ref[2 * b]
    x_mn = stats_ref[2 * b + 1]
    k_hi = jnp.maximum(wk * x_mx, wk * x_mn) + bk
    k_lo = jnp.minimum(wk * x_mx, wk * x_mn) + bk
    m = jnp.where(q >= 0.0, q * k_hi, q * k_lo)    # (1, Tq)

    # Unnormalized softmax weights: the only N^2 transcendental + VPU work.
    # Outer product as a VPU broadcast multiply (no degenerate K=1 MXU matmul).
    p = jnp.exp(k_col * q - m)                     # (Tk, Tq), f32 exp

    # Fused value + normalizer reduction on the otherwise idle MXU:
    #   [num ; den] += [v ; 1] @ p   (bf16 operands, f32 accumulate).
    tk = v_row.shape[1]
    row_ix = lax.broadcasted_iota(jnp.int32, (2, tk), 0)
    lhs = jnp.where(row_ix == 0, jnp.broadcast_to(v_row, (2, tk)), 1.0)  # (2,Tk)
    acc_ref[...] += jnp.dot(lhs.astype(jnp.bfloat16),
                            p.astype(jnp.bfloat16),
                            preferred_element_type=jnp.float32)          # (2,Tq)

    @pl.when(kc == last_kc)
    def _finalize():
        num = acc_ref[0:1, :]                      # (1, Tq)
        den = acc_ref[1:2, :]                      # (1, Tq), always > 0
        o_ref[...] = (gamma * (num / den) + x_q).astype(o_ref.dtype)


def _divisors(n):
    out = set()
    i = 1
    while i * i <= n:
        if n % i == 0:
            out.add(i)
            out.add(n // i)
        i += 1
    return sorted(out)


def _pick_tile(cap, divs):
    """Largest divisor <= cap, preferring multiples of 128, then 8."""
    cands = [d for d in divs if d <= cap]
    if not cands:
        return 1
    for mod in (128, 8):
        m = [d for d in cands if d % mod == 0]
        if m:
            return max(m)
    return max(cands)


def _choose_tiles(n, batch, temp_budget_bytes=10 << 20):
    """Pick (Tq, Tk), both divisors of N.

    Tq: largest divisor <= 1024 (lane-friendly multiples of 128/8 preferred);
        if B < 2 we additionally aim for >= 2 query tiles so v7x's second
        TensorCore has parallel grid steps to pick up.
    Tk: largest divisor keeping the live (Tk, Tq) temporaries (~3 f32 copies of
        the energy/exp tile + 1 bf16 copy ~= 14 B/elem) inside the budget; the
        padded (Tk, 128) column buffers and (8, T) row buffers are small on top
        and covered by the 32 MiB vmem_limit_bytes headroom.
    """
    divs = _divisors(n)
    tq = _pick_tile(min(n, 1024), divs)
    if batch < 2 and n >= 2:
        alt = _pick_tile(min(n // 2, 1024), divs)
        if alt >= 8:
            tq = min(tq, alt)
    per_elem_bytes = 14
    tk_cap = max(1, temp_budget_bytes // (per_elem_bytes * tq))
    tk = _pick_tile(min(n, tk_cap), divs)
    return tq, tk


def self_attn(x, params):
    """x: (B, 1, W, H) float32; params: f32[7] = [wq, bq, wk, bk, wv, bv, gamma]."""
    B, C, W, H = x.shape
    assert C == 1, "Self_Attn is built with in_dim=1"
    N = W * H
    Tq, Tk = _choose_tiles(N, B)
    assert N % Tq == 0 and N % Tk == 0
    n_t = N // Tq
    n_k = N // Tk

    # Host-side views of the same flattened pixels (metadata-only reshapes).
    # 4-D shapes keep the last two block dims equal to the full array dims, so
    # the (8,128) block-shape rule is satisfied for any divisor Tq / Tk.
    x_q = x.reshape(B, n_t, 1, Tq)       # query tiles / residual, lane dense
    x_kr = x.reshape(B, n_k, 1, Tk)      # key/value chunk, row layout
    x_kc = x.reshape(B, n_k, Tk, 1)      # key/value chunk, column layout

    # Per-batch global extremes for the exact analytic softmax row max.
    x_flat = x.reshape(B, N)
    stats = jnp.stack([jnp.max(x_flat, axis=1), jnp.min(x_flat, axis=1)],
                      axis=1).reshape(2 * B).astype(jnp.float32)

    flops = 6 * B * N * N                          # q*k, -m, 2-col MAC per (i,j)
    transcendentals = B * N * N                    # one exp per (i,j)
    bytes_accessed = 4 * B * N * (2 + 2 * n_t)     # q/out once, kv refetched per tile

    out = pl.pallas_call(
        _self_attn_kernel,
        out_shape=jax.ShapeDtypeStruct((B, n_t, 1, Tq), x.dtype),
        grid=(B, n_t, n_k),
        in_specs=[
            pl.BlockSpec(memory_space=pltpu.MemorySpace.SMEM),            # params
            pl.BlockSpec(memory_space=pltpu.MemorySpace.SMEM),            # stats
            pl.BlockSpec((None, None, 1, Tq), lambda b, t, kc: (b, t, 0, 0)),
            pl.BlockSpec((None, None, 1, Tk), lambda b, t, kc: (b, kc, 0, 0)),
            pl.BlockSpec((None, None, Tk, 1), lambda b, t, kc: (b, kc, 0, 0)),
        ],
        out_specs=pl.BlockSpec((None, None, 1, Tq), lambda b, t, kc: (b, t, 0, 0)),
        scratch_shapes=[pltpu.VMEM((2, Tq), jnp.float32)],
        compiler_params=pltpu.CompilerParams(
            dimension_semantics=("parallel", "parallel", "arbitrary"),
            vmem_limit_bytes=32 * 1024 * 1024),
        cost_estimate=pl.CostEstimate(
            flops=flops,
            transcendentals=transcendentals,
            bytes_accessed=bytes_accessed),
    )(params.astype(jnp.float32), stats, x_q, x_kr, x_kc)

    return out.reshape(B, C, W, H)


def _reference(x, params):
    """Pure-JAX replica of the PyTorch forward for validation."""
    wq, bq, wk, bk, wv, bv, gamma = [params[i] for i in range(7)]
    B, C, W, H = x.shape
    N = W * H
    xf = x.reshape(B, C, N)
    proj_query = jnp.transpose(wq * xf + bq, (0, 2, 1))          # (B, N, 1)
    proj_key = wk * xf + bk                                      # (B, 1, N)
    proj_value = wv * xf + bv                                    # (B, 1, N)
    energy = jnp.einsum('bnc,bcm->bnm', proj_query, proj_key)    # (B, N, N)
    attention = jax.nn.softmax(energy, axis=-1)
    out = jnp.einsum('bcn,bmn->bcm', proj_value, attention)      # (B, 1, N)
    out = out.reshape(B, C, W, H)
    return gamma * out + x


if __name__ == "__main__":
    key = jax.random.PRNGKey(0)
    B, C, W, H = 2, 1, 16, 16                   # N = 256
    x = jax.random.normal(key, (B, C, W, H), dtype=jnp.float32)

    # [wq, bq, wk, bk, wv, bv, gamma]; PyTorch inits gamma = 0, use a nonzero
    # value so the attention path actually contributes to the output.
    params = jnp.array([0.8, 0.05, -0.6, 0.02, 1.2, -0.03, 0.5], dtype=jnp.float32)

    out = jax.block_until_ready(self_attn(x, params))
    ref = jax.block_until_ready(_reference(x, params))

    assert out.shape == x.shape
    # Tolerance covers the bf16 rounding of the softmax weights / values fed to
    # the MXU reduction (review-suggested); a real bug would be off by O(0.1-1).
    assert jnp.allclose(out, ref, atol=2e-2, rtol=2e-2), "mismatch vs reference"
    print("KERNEL_OK")
</pallas_src>

<mosaic_0001>
module attributes {stable_mosaic.version = 11 : i64} {
  func.func @_self_attn_kernel(%arg0: i32, %arg1: i32, %arg2: i32, %arg3: memref<7xf32, #tpu.memory_space<smem>>, %arg4: memref<4xf32, #tpu.memory_space<smem>>, %arg5: memref<1x1x1x256xf32, #tpu.memory_space<vmem>>, %arg6: memref<1x1x1x256xf32, #tpu.memory_space<vmem>>, %arg7: memref<1x1x256x1xf32, #tpu.memory_space<vmem>>, %arg8: memref<1x1x1x256xf32, #tpu.memory_space<vmem>>, %arg9: memref<2x256xf32, #tpu.memory_space<vmem>>) attributes {dimension_semantics = [#tpu.dimension_semantics<parallel>, #tpu.dimension_semantics<parallel>, #tpu.dimension_semantics<arbitrary>], iteration_bounds = array<i64: 2, 1, 1>, scalar_prefetch = 0 : i64, scratch_operands = 1 : i64, tpu.core_type = #tpu.core_type<tc>, window_params = [{transform_indices = @transform_0, window_bounds = array<i64: 7>}, {transform_indices = @transform_1, window_bounds = array<i64: 4>}, {transform_indices = @transform_2, window_bounds = array<i64: 1, 1, 1, 256>}, {transform_indices = @transform_3, window_bounds = array<i64: 1, 1, 1, 256>}, {transform_indices = @transform_4, window_bounds = array<i64: 1, 1, 256, 1>}, {transform_indices = @transform_5, window_bounds = array<i64: 1, 1, 1, 256>}]} {
    %c0 = arith.constant 0 : index
    %0 = memref.load %arg3[%c0] : memref<7xf32, #tpu.memory_space<smem>>
    %c1 = arith.constant 1 : index
    %1 = memref.load %arg3[%c1] : memref<7xf32, #tpu.memory_space<smem>>
    %c2 = arith.constant 2 : index
    %2 = memref.load %arg3[%c2] : memref<7xf32, #tpu.memory_space<smem>>
    %c3 = arith.constant 3 : index
    %3 = memref.load %arg3[%c3] : memref<7xf32, #tpu.memory_space<smem>>
    %c4 = arith.constant 4 : index
    %4 = memref.load %arg3[%c4] : memref<7xf32, #tpu.memory_space<smem>>
    %c5 = arith.constant 5 : index
    %5 = memref.load %arg3[%c5] : memref<7xf32, #tpu.memory_space<smem>>
    %c6 = arith.constant 6 : index
    %6 = memref.load %arg3[%c6] : memref<7xf32, #tpu.memory_space<smem>>
    %c0_i32 = arith.constant 0 : i32
    %7 = arith.cmpi eq, %arg2, %c0_i32 : i32
    %8 = arith.extui %7 : i1 to i32
    %c0_i32_0 = arith.constant 0 : i32
    %9 = arith.cmpi ne, %8, %c0_i32_0 : i32
    scf.if %9 {
      %cst_23 = arith.constant 0.000000e+00 : f32
      %72 = vector.broadcast %cst_23 : f32 to vector<2x256xf32>
      %c0_24 = arith.constant 0 : index
      %c0_25 = arith.constant 0 : index
      %73 = vector.load %arg9[%c0_24, %c0_25] : memref<2x256xf32, #tpu.memory_space<vmem>>, vector<2x256xf32>
      tpu.vector_store %arg9[%c0_24, %c0_25], %72 {strides = array<i32>} : memref<2x256xf32, #tpu.memory_space<vmem>>, vector<2x256xf32>,
    } else {
    }
    %c0_1 = arith.constant 0 : index
    %c0_2 = arith.constant 0 : index
    %c0_3 = arith.constant 0 : index
    %c0_4 = arith.constant 0 : index
    %10 = vector.load %arg5[%c0_1, %c0_2, %c0_3, %c0_4] : memref<1x1x1x256xf32, #tpu.memory_space<vmem>>, vector<1x1x1x256xf32>
    %11 = vector.shape_cast %10 : vector<1x1x1x256xf32> to vector<1x256xf32>
    %c0_5 = arith.constant 0 : index
    %c0_6 = arith.constant 0 : index
    %c0_7 = arith.constant 0 : index
    %c0_8 = arith.constant 0 : index
    %12 = vector.load %arg6[%c0_5, %c0_6, %c0_7, %c0_8] : memref<1x1x1x256xf32, #tpu.memory_space<vmem>>, vector<1x1x1x256xf32>
    %13 = vector.shape_cast %12 : vector<1x1x1x256xf32> to vector<1x256xf32>
    %c0_9 = arith.constant 0 : index
    %c0_10 = arith.constant 0 : index
    %c0_11 = arith.constant 0 : index
    %c0_12 = arith.constant 0 : index
    %14 = vector.load %arg7[%c0_9, %c0_10, %c0_11, %c0_12] : memref<1x1x256x1xf32, #tpu.memory_space<vmem>>, vector<1x1x256x1xf32>
    %15 = vector.shape_cast %14 : vector<1x1x256x1xf32> to vector<256x1xf32>
    %16 = vector.broadcast %0 : f32 to vector<1x256xf32>
    %17 = arith.mulf %16, %11 : vector<1x256xf32>
    %18 = vector.broadcast %1 : f32 to vector<1x256xf32>
    %19 = arith.addf %17, %18 : vector<1x256xf32>
    %20 = vector.broadcast %2 : f32 to vector<256x1xf32>
    %21 = arith.mulf %20, %15 : vector<256x1xf32>
    %22 = vector.broadcast %3 : f32 to vector<256x1xf32>
    %23 = arith.addf %21, %22 : vector<256x1xf32>
    %24 = vector.broadcast %4 : f32 to vector<1x256xf32>
    %25 = arith.mulf %24, %13 : vector<1x256xf32>
    %26 = vector.broadcast %5 : f32 to vector<1x256xf32>
    %27 = arith.addf %25, %26 : vector<1x256xf32>
    %c2_i32 = arith.constant 2 : i32
    %28 = arith.muli %c2_i32, %arg0 : i32
    %29 = arith.index_cast %28 : i32 to index
    %30 = memref.load %arg4[%29] : memref<4xf32, #tpu.memory_space<smem>>
    %c2_i32_13 = arith.constant 2 : i32
    %31 = arith.muli %c2_i32_13, %arg0 : i32
    %c1_i32 = arith.constant 1 : i32
    %32 = arith.addi %31, %c1_i32 : i32
    %33 = arith.index_cast %32 : i32 to index
    %34 = memref.load %arg4[%33] : memref<4xf32, #tpu.memory_space<smem>>
    %35 = arith.mulf %2, %30 : f32
    %36 = arith.mulf %2, %34 : f32
    %37 = arith.maximumf %35, %36 : f32
    %38 = arith.addf %37, %3 : f32
    %39 = arith.mulf %2, %30 : f32
    %40 = arith.mulf %2, %34 : f32
    %41 = arith.minimumf %39, %40 : f32
    %42 = arith.addf %41, %3 : f32
    %cst = arith.constant 0.000000e+00 : f32
    %43 = vector.broadcast %cst : f32 to vector<1x256xf32>
    %44 = arith.cmpf oge, %19, %43 : vector<1x256xf32>
    %45 = vector.broadcast %38 : f32 to vector<1x256xf32>
    %46 = arith.mulf %19, %45 : vector<1x256xf32>
    %47 = vector.broadcast %42 : f32 to vector<1x256xf32>
    %48 = arith.mulf %19, %47 : vector<1x256xf32>
    %49 = arith.select %44, %46, %48 : vector<1x256xi1>, vector<1x256xf32>
    %50 = vector.broadcast %23 : vector<256x1xf32> to vector<256x256xf32>
    %51 = vector.broadcast %19 : vector<1x256xf32> to vector<256x256xf32>
    %52 = arith.mulf %50, %51 : vector<256x256xf32>
    %53 = vector.broadcast %49 : vector<1x256xf32> to vector<256x256xf32>
    %54 = arith.subf %52, %53 : vector<256x256xf32>
    %55 = math.exp %54 : vector<256x256xf32>
    %56 = tpu.iota {dimensions = array<i32: 0>} : vector<2x256xi32>
    %c0_i32_14 = arith.constant 0 : i32
    %57 = vector.broadcast %c0_i32_14 : i32 to vector<2x256xi32>
    %58 = arith.cmpi eq, %56, %57 : vector<2x256xi32>
    %59 = vector.shape_cast %27 : vector<1x256xf32> to vector<1x256xf32>
    %60 = vector.broadcast %59 : vector<1x256xf32> to vector<2x256xf32>
    %cst_15 = arith.constant 1.000000e+00 : f32
    %61 = vector.broadcast %cst_15 : f32 to vector<2x256xf32>
    %62 = arith.select %58, %60, %61 : vector<2x256xi1>, vector<2x256xf32>
    %c0_16 = arith.constant 0 : index
    %c0_17 = arith.constant 0 : index
    %63 = vector.load %arg9[%c0_16, %c0_17] : memref<2x256xf32, #tpu.memory_space<vmem>>, vector<2x256xf32>
    %64 = arith.truncf %62 : vector<2x256xf32> to vector<2x256xbf16>
    %65 = arith.truncf %55 : vector<256x256xf32> to vector<256x256xbf16>
    %cst_18 = arith.constant dense<0.000000e+00> : vector<2x256xf32>
    %66 = tpu.matmul %64, %65, %cst_18 {dimension_numbers = #tpu.dot_dimension_numbers<[1], [0], [0], [1], [0, 0, 1, 1], [], []>} : vector<2x256xbf16>, vector<256x256xbf16>, vector<2x256xf32> -> vector<2x256xf32>
    %67 = arith.addf %63, %66 : vector<2x256xf32>
    %c0_19 = arith.constant 0 : index
    %c0_20 = arith.constant 0 : index
    %68 = vector.load %arg9[%c0_19, %c0_20] : memref<2x256xf32, #tpu.memory_space<vmem>>, vector<2x256xf32>
    tpu.vector_store %arg9[%c0_19, %c0_20], %67 {strides = array<i32>} : memref<2x256xf32, #tpu.memory_space<vmem>>, vector<2x256xf32>,
    %c0_i32_21 = arith.constant 0 : i32
    %69 = arith.cmpi eq, %arg2, %c0_i32_21 : i32
    %70 = arith.extui %69 : i1 to i32
    %c0_i32_22 = arith.constant 0 : i32
    %71 = arith.cmpi ne, %70, %c0_i32_22 : i32
    scf.if %71 {
      %c0_23 = arith.constant 0 : index
      %c0_24 = arith.constant 0 : index
      %72 = vector.load %arg9[%c0_23, %c0_24] : memref<2x256xf32, #tpu.memory_space<vmem>>, vector<1x256xf32>
      %c1_25 = arith.constant 1 : index
      %c0_26 = arith.constant 0 : index
      %73 = vector.load %arg9[%c1_25, %c0_26] : memref<2x256xf32, #tpu.memory_space<vmem>>, vector<1x256xf32>
      %74 = arith.divf %72, %73 : vector<1x256xf32>
      %75 = vector.broadcast %6 : f32 to vector<1x256xf32>
      %76 = arith.mulf %75, %74 : vector<1x256xf32>
      %77 = arith.addf %76, %11 : vector<1x256xf32>
      %c0_27 = arith.constant 0 : index
      %c0_28 = arith.constant 0 : index
      %c0_29 = arith.constant 0 : index
      %c0_30 = arith.constant 0 : index
      %78 = vector.load %arg8[%c0_27, %c0_28, %c0_29, %c0_30] : memref<1x1x1x256xf32, #tpu.memory_space<vmem>>, vector<1x1x1x256xf32>
      %79 = vector.shape_cast %78 : vector<1x1x1x256xf32> to vector<1x256xf32>
      %80 = vector.shape_cast %77 : vector<1x256xf32> to vector<1x1x1x256xf32>
      tpu.vector_store %arg8[%c0_27, %c0_28, %c0_29, %c0_30], %80 {strides = array<i32>} : memref<1x1x1x256xf32, #tpu.memory_space<vmem>>, vector<1x1x1x256xf32>,
    } else {
    }
    return
  }
  func.func @transform_0(%arg0: i32, %arg1: i32, %arg2: i32) -> i32 {
    %c0_i32 = arith.constant 0 : i32
    %c0_i32_0 = arith.constant 0 : i32
    return %c0_i32 : i32
  }
  func.func @transform_1(%arg0: i32, %arg1: i32, %arg2: i32) -> i32 {
    %c0_i32 = arith.constant 0 : i32
    %c0_i32_0 = arith.constant 0 : i32
    return %c0_i32 : i32
  }
  func.func @transform_2(%arg0: i32, %arg1: i32, %arg2: i32) -> (i32, i32, i32, i32) {
    %c0_i32 = arith.constant 0 : i32
    %c0_i32_0 = arith.constant 0 : i32
    %c0_i32_1 = arith.constant 0 : i32
    return %arg0, %arg1, %c0_i32, %c0_i32_0 : i32, i32, i32, i32
  }
  func.func @transform_3(%arg0: i32, %arg1: i32, %arg2: i32) -> (i32, i32, i32, i32) {
    %c0_i32 = arith.constant 0 : i32
    %c0_i32_0 = arith.constant 0 : i32
    %c0_i32_1 = arith.constant 0 : i32
    return %arg0, %arg2, %c0_i32, %c0_i32_0 : i32, i32, i32, i32
  }
  func.func @transform_4(%arg0: i32, %arg1: i32, %arg2: i32) -> (i32, i32, i32, i32) {
    %c0_i32 = arith.constant 0 : i32
    %c0_i32_0 = arith.constant 0 : i32
    %c0_i32_1 = arith.constant 0 : i32
    return %arg0, %arg2, %c0_i32, %c0_i32_0 : i32, i32, i32, i32
  }
  func.func @transform_5(%arg0: i32, %arg1: i32, %arg2: i32) -> (i32, i32, i32, i32) {
    %c0_i32 = arith.constant 0 : i32
    %c0_i32_0 = arith.constant 0 : i32
    %c0_i32_1 = arith.constant 0 : i32
    return %arg0, %arg1, %c0_i32, %c0_i32_0 : i32, i32, i32, i32
  }
}

</mosaic_0001>

<bundles_post_ra>
// kernel: tpu_custom_call.1
= control target key start
LH: loop header
LB: loop body
LE: loop exit
PB: predicated region body
PF: predicated region fallthrough
CT: control target
= control target key end

     0   :  { %10 = vsyncpa [#allocation5], 0  ;;  %s2132_s0 = inlined_call_operand.vmem [shape: f32[7], index: 0, kind: input, shape index: {}]   ;;  %s2133_s1 = inlined_call_operand.vmem [shape: f32[4], index: 1, kind: input, shape index: {}]   ;;  %s2134_s2 = inlined_call_operand.vmem [shape: f32[2,1,1,256], index: 2, kind: input, shape index: {}]   ;;  %s2135_s3 = inlined_call_operand.vmem [shape: f32[2,1,1,256], index: 3, kind: input, shape index: {}]   ;;  %s2136_s4 = inlined_call_operand.vmem [shape: f32[2,1,256,1], index: 4, kind: input, shape index: {}]   ;;  %s2137_s5 = inlined_call_operand.hbm [shape: f32[2,1,1,256], index: 5, kind: output, shape index: {}]  }
   0x1   :  { %11 = vsyncpa [#allocation7], 0 }
   0x2   :  { %12 = vsyncpa [#allocation4], 0 }
   0x3   :  { %14 = vsyncpa [#allocation4 + $0x1], 0  ;;  %s1593_s18 = smov 0   ;;  %s1595_s19 = smov 0  }
   0x4   :  { %s1597_s20 = smov 0   ;;  %s1599_s21 = smov 0  }
   0x5   :  { %s1601_s22 = smov 0   ;;  %s1603_s23 = smov 0  }
   0x6 LB: > { %s1199_s24 = sadd.s32 4294967295, %s1555_s23   ;;  %s1200_s25 = sadd.s32 4294967294, %s1555_s23   ;;  %s1555_s23 = sphi %s1603_s23, %s20_s23   ;;  %s1551_s22 = sphi %s1601_s22, %s2155_s22   ;;  %s1547_s21 = sphi %s1599_s21, %s2154_s21   ;;  %s1543_s20 = sphi %s1597_s20, %s2153_s20   ;;  %s1539_s19 = sphi %s1595_s19, %s2152_s19   ;;  %s1535_s18 = sphi %s1593_s18, %s2151_s18  }
   0x7   : > { %s39_s26 = sadd.s32 1, %s1551_s22  ;;  %s174_s27 = sadd.s32 1, %s1543_s20 }
   0x8   : > { %p41_p0 = scmp.ge.s32.totalorder %s39_s26, 2  ;;  %p184_p1 = scmp.ne.s32.totalorder %s1543_s20, %s1539_s19 }
   0x9   : > { %p185_p2 = scmp.eq.s32.totalorder %s1199_s24, 1  ;;  %p190_p3 = scmp.ne.s32.totalorder %s1539_s19, %s1535_s18 }
   0xa   : > { %s2157_s26 = smov (%p41_p0, %s39_s26), 0  ;;  %p191_p5 = scmp.eq.s32.totalorder %s1200_s25, 1 }
   0xb   : > { %p1633_p4 = por %p185_p2, %p184_p1  ;;  %s169_s29 = ssub.s32 %s1551_s22, %s2157_s26 }
   0xc   : > { %p1201_p6 = scmp.ge.s32.totalorder %s1555_s23, 1  ;;  %p172_p7 = scmp.eq.s32.totalorder %s169_s29, 0 }
   0xd   : > { %s2142_s28 = scalar_select %p1633_p4, 1, 0 }
   0xe   : > { %p1640_p8 = por %p191_p5, %p190_p3  ;;  %p198_p9 = scmp.lt.s32.totalorder %s1555_s23, 3 }
   0xf   : > { %s1646_s6 = scalar_select %p172_p7, %s1543_s20, %s174_s27  }
  0x10   : > { %s2143_s30 = scalar_select %p1640_p8, 1, 0 }
  0x11   : > { %p1648_p10 = pnand %p1201_p6, %p198_p9  ;;  %p1652_p11 = scmp.eq.s32.totalorder %s1199_s24, 0 }
  0x12   : > { %s211_s11 = sshll.u32 %s2132_s0, 4  ;;  %s222_s14 = sshll.u32 %s2133_s1, 4  ;;  %s212_s11 = int_to_ptr.vmem [resolvable:$true] %s211_s11  ;;  %s223_s14 = int_to_ptr.vmem [resolvable:$true] %s222_s14 }
  0x13   : > { %s2144_s7 = scalar_select %p1648_p10, 1, 0 }
  0x14   : > { %s2145_s8 = scalar_select %p1652_p11, 1, 0 }
  0x15   : > { %p1237_p12 = pneg %p1648_p10  ;;  %s1439_s16 = scalar_lea.vmem %s212_s11, 16 }
  0x16   : > { %p1440_p0 = scmp.ne.s32.totalorder %s212_s11, %s1439_s16  ;;  %p1447_p5 = scmp.lt.s32.totalorder %s212_s11, %s212_s11 }
  0x17   : > { %p1666_p13 = pnand %p1652_p11, %p1237_p12  ;;  %p1448_p6 = scmp.lt.s32.totalorder %s1439_s16, %s1439_s16 }
  0x19   : > { %p1441_p1 = pneg %p1666_p13  ;;  %p1449_p7 = por %p1448_p6, %p1447_p5 }
  0x1b   : > { %p1442_p2 = pnand %p1441_p1, %p1440_p0 }
  0x1d   : > { %p1443_p3 = pneg %p1442_p2 }
  0x1f   : > { %p1450_p9 = pnand %p1449_p7, %p1443_p3 }
  0x21   : > { %1453 = shalt.err (!%p1450_p9)
}
  0x22   : > { %s1557_s17 = smov [#allocation3]   ;;  %s1454_s24 = scalar_lea.vmem %s223_s14, 16 }
  0x23   : > { %1240 = dma.vmem_to_smem (!%p1666_p13), %s212_s11, 16, %s1557_s17, [#allocation5]  }
  0x24   : > { %p1455_p12 = scmp.ne.s32.totalorder %s223_s14, %s1454_s24  ;;  %p1462_p11 = scmp.lt.s32.totalorder %s223_s14, %s223_s14 }
  0x25   : > { %p1463_p10 = scmp.lt.s32.totalorder %s1454_s24, %s1454_s24 }
  0x26   : > { %p1457_p8 = pnand %p1455_p12, %p1441_p1 }
  0x27   : > { %p1464_p0 = por %p1463_p10, %p1462_p11 }
  0x28   : > { %p1458_p4 = pneg %p1457_p8 }
  0x2a   : > { %p1465_p2 = pnand %p1464_p0, %p1458_p4 }
  0x2c   : > { %1468 = shalt.err (!%p1465_p2)
}
  0x2d   : > { %s1558_s25 = smov [#allocation6]   ;;  %p2147_p3 = scmp.ne.s32.totalorder %s2144_s7, 0 }
  0x2e   : > { %1243 = dma.vmem_to_smem (!%p1666_p13), %s223_s14, 16, %s1558_s25, [#allocation7]  }
  0x2f   : > { %269 = sbr.rel (%p2147_p3) target bundleno = 554 (0x22a), region = 40  ;;  %p2148_p5 = scmp.ne.s32.totalorder (!%p2147_p3), %s2145_s8, 0 }
  0x36   : > { %1522 = dma.done.wait (%p2148_p5), [#allocation5], 16  }
  0x37   : > { %1524 = vsyncadd (%p2148_p5), [#allocation5], 4294967280 }
  0x38   : > { %1526 = dma.done.wait (%p2148_p5), [#allocation7], 16  }
  0x39   : > { %1528 = vsyncadd (%p2148_p5), [#allocation7], 4294967280 }
  0x3a   : > { %279 = sfence }
  0x3b   : > { %p322_p4 = scmp.lt.s32.totalorder %s1547_s21, 1  ;;  %s1687_s27 = sld [smem:[#allocation3]]  ;;  %v1559_v0 = vmov 0  }
  0x3c   : > { %1307 = vset.pattern.permute.xlu1 %v1559_v0  ;;  %1306 = vset.pattern.permute.xlu0 %v1559_v0  ;;  %s1689_s29 = sld [smem:[#allocation3 + $0x1]]  ;;  %s1691_s7 = sld [smem:[#allocation3 + $0x2]] }
  0x3d   : > { %s1694_s9 = scalar_select %p322_p4, %s1547_s21, 1 }
  0x3e   : > { %s1696_s8 = sld [smem:[#allocation3 + $0x3]]  ;;  %s1219_s10 = sshll.u32 %s1547_s21, 1 }
  0x3f   : > { %s1225_s11 = sshll.u32 %s1694_s9, 8  ;;  %s468_s12 = sld [smem:[#allocation6 + %s1219_s10]] }
  0x40   : > { %s1703_s15 = scalar_lea.vmem %s2136_s4, %s1225_s11  ;;  %s469_s16 = sadd.s32 1, %s1219_s10 }
  0x41   : > { %v363_v1 = vld [vmem:[%s1703_s15 + $0x10] sm:$0xff]  ;;  %s470_s17 = sld [smem:[#allocation6 + %s469_s16]]  ;;  %s1209_s24 = sshll.u32 %s1694_s9, 1  ;;  %v361_v2 = vld [vmem:[%s1703_s15] sm:$0xff]  ;;  %v364_v3 = vld [vmem:[%s1703_s15 + $0x18] sm:$0xff]  ;;  %v393_v4 = vstv %s1687_s27 }
  0x42   : > { %v1711_v5 = vstv %s1691_s7  ;;  %s1718_s13 = scalar_lea.vmem %s2134_s2, %s1209_s24  ;;  %v362_v6 = vld [vmem:[%s1703_s15 + $0x8] sm:$0xff]  ;;  %v365_v14 = vld [vmem:[%s1703_s15 + $0x20] sm:$0xff]  ;;  %v395_v18 = vstv %s1689_s29  ;;  %s337_s25 = scalar_lea.vmem %s2135_s3, %s1209_s24 }
  0x43   : > { %v400_v7 = vmul.f32 %v1711_v5, %v363_v1  ;;  %v359_v8 = vld [vmem:[%s1718_s13] sm:$0x3]  ;;  %v398_v9 = vmul.f32 %v1711_v5, %v361_v2  ;;  %v401_v10 = vmul.f32 %v1711_v5, %v364_v3  ;;  %v399_v11 = vmul.f32 %v1711_v5, %v362_v6  ;;  %v366_v12 = vld [vmem:[%s1703_s15 + $0x28] sm:$0xff]  ;;  %v368_v23 = vld [vmem:[%s1703_s15 + $0x38] sm:$0xff]  ;;  %s1218_s9 = sld [smem:[#allocation3 + $0x6]]  ;;  %s319_s24 = sand.u32 1, %s1539_s19  }
  0x44   : > { %v1728_v13 = vstv %s1696_s8  ;;  %v394_v16 = vmul.f32 %v393_v4, %v359_v8  ;;  %v403_v19 = vmul.f32 %v1711_v5, %v366_v12  ;;  %v402_v22 = vmul.f32 %v1711_v5, %v365_v14  ;;  %v367_v24 = vld [vmem:[%s1703_s15 + $0x30] sm:$0xff]  ;;  %v370_v30 = vld [vmem:[%s1703_s15 + $0x48] sm:$0xff]  ;;  %v369_v32 = vld [vmem:[%s1703_s15 + $0x40] sm:$0xff]  ;;  %s1208_s11 = sshll.u32 %s319_s24, 1  ;;  %p2149_p10 = scmp.ne.s32.totalorder %s2142_s28, 0 }
  0x45   : > { %v433_v15 = vadd.f32 %v1728_v13, %v400_v7  ;;  %s471_s27 = smul.f32 %s1691_s7, %s468_s12  ;;  %v431_v17 = vadd.f32 %v1728_v13, %v398_v9  ;;  %v434_v20 = vadd.f32 %v1728_v13, %v401_v10  ;;  %v432_v21 = vadd.f32 %v1728_v13, %v399_v11  ;;  %v372_v41 = vld [vmem:[%s1703_s15 + $0x58] sm:$0xff]  ;;  %v371_v42 = vld [vmem:[%s1703_s15 + $0x50] sm:$0xff]  ;;  %v374_v47 = vld [vmem:[%s1703_s15 + $0x68] sm:$0xff] }
  0x46   : > { %v1742_v25 = vadd.f32 %v395_v18, %v394_v16  ;;  %v436_v26 = vadd.f32 %v1728_v13, %v403_v19  ;;  %v435_v27 = vadd.f32 %v1728_v13, %v402_v22  ;;  %v405_v28 = vmul.f32 %v1711_v5, %v368_v23  ;;  %v373_v48 = vld [vmem:[%s1703_s15 + $0x60] sm:$0xff]  ;;  %v376_v53 = vld [vmem:[%s1703_s15 + $0x78] sm:$0xff]  ;;  %v375_v54 = vld [vmem:[%s1703_s15 + $0x70] sm:$0xff] }
  0x47   : > { %s472_s10 = smul.f32 %s1691_s7, %s470_s17  ;;  %495 = vperm.xlu1 %1307, %v433_v15   ;;  %485 = vperm.xlu0 %1306, %v431_v17   ;;  %v404_v29 = vmul.f32 %v1711_v5, %v367_v24  ;;  %v407_v36 = vmul.f32 %v1711_v5, %v370_v30  ;;  %v406_v39 = vmul.f32 %v1711_v5, %v369_v32  ;;  %v378_v59 = vld [vmem:[%s1703_s15 + $0x88] sm:$0xff]  ;;  %v377_v60 = vld [vmem:[%s1703_s15 + $0x80] sm:$0xff]  ;;  %v380_v1 = vld [vmem:[%s1703_s15 + $0x98] sm:$0xff] }
  0x48   : > { %vm477_vm0 = vcmp.ge.f32.partialorder %v1742_v25, 0.0  ;;  %v438_v37 = vadd.f32 %v1728_v13, %v405_v28  ;;  %v409_v45 = vmul.f32 %v1711_v5, %v372_v41  ;;  %v408_v46 = vmul.f32 %v1711_v5, %v371_v42  ;;  %v379_v2 = vld [vmem:[%s1703_s15 + $0x90] sm:$0xff]  ;;  %v382_v8 = vld [vmem:[%s1703_s15 + $0xa8] sm:$0xff]  ;;  %v381_v9 = vld [vmem:[%s1703_s15 + $0xa0] sm:$0xff] }
  0x49   : > { %s473_s12 = smax.f32 %s472_s10, %s471_s27  ;;  %s475_s14 = smin.f32 %s472_s10, %s471_s27  ;;  %v437_v38 = vadd.f32 %v1728_v13, %v404_v29  ;;  %v440_v43 = vadd.f32 %v1728_v13, %v407_v36  ;;  %v439_v44 = vadd.f32 %v1728_v13, %v406_v39  ;;  %v411_v49 = vmul.f32 %v1711_v5, %v374_v47  ;;  %v384_v15 = vld [vmem:[%s1703_s15 + $0xb8] sm:$0xff]  ;;  %v383_v16 = vld [vmem:[%s1703_s15 + $0xb0] sm:$0xff]  ;;  %v385_v22 = vld [vmem:[%s1703_s15 + $0xc0] sm:$0xff] }
  0x4a   : > { %s474_s29 = sadd.f32 %s1696_s8, %s473_s12  ;;  %v442_v50 = vadd.f32 %v1728_v13, %v409_v45  ;;  %v441_v51 = vadd.f32 %v1728_v13, %v408_v46  ;;  %v410_v52 = vmul.f32 %v1711_v5, %v373_v48  ;;  %v413_v55 = vmul.f32 %v1711_v5, %v376_v53  ;;  %v388_v28 = vld [vmem:[%s1703_s15 + $0xd8] sm:$0xff]  ;;  %v387_v29 = vld [vmem:[%s1703_s15 + $0xd0] sm:$0xff]  ;;  %s1226_s27 = sshll.u32 %s1547_s21, 5 }
  0x4b   : > { %s476_s7 = sadd.f32 %s1696_s8, %s475_s14  ;;  %500 = vperm.xlu1 %1307, %v434_v20   ;;  %490 = vperm.xlu0 %1306, %v432_v21   ;;  %v444_v56 = vadd.f32 %v1728_v13, %v411_v49  ;;  %v412_v58 = vmul.f32 %v1711_v5, %v375_v54  ;;  %v415_v61 = vmul.f32 %v1711_v5, %v378_v59  ;;  %v386_v21 = vld [vmem:[%s1703_s15 + $0xc8] sm:$0xff]  ;;  %v392_v41 = vld [vmem:[%s1703_s15 + $0xf8] sm:$0xff]  ;;  %v391_v42 = vld [vmem:[%s1703_s15 + $0xf0] sm:$0xff]  ;;  %s1216_s8 = sld [smem:[#allocation3 + $0x4]]  ;;  %v644_v49 = vlaneseq }
  0x4c   : > { %v478_v31 = vstv %s474_s29  ;;  %v443_v57 = vadd.f32 %v1728_v13, %v410_v52  ;;  %v446_v62 = vadd.f32 %v1728_v13, %v413_v55  ;;  %v414_v0 = vmul.f32 %v1711_v5, %v377_v60  ;;  %s321_s10 = scalar_lea.vmem [#allocation8], %s1208_s11 }
  0x4d   : > { %v480_v33 = vstv %s476_s7  ;;  %v479_v34 = vmul.f32 %v478_v31, %v1742_v25  ;;  %v445_v63 = vadd.f32 %v1728_v13, %v412_v58  ;;  %v448_v3 = vadd.f32 %v1728_v13, %v415_v61  ;;  %s1059_s12 = sshll.u32 %s321_s10, 4  ;;  %s2085_s7 = scalar_lea.hbm %s2137_s5, %s1226_s27  ;;  %s2087_s12 = int_to_ptr.vmem [resolvable:$true] %s1059_s12 }
  0x4e   : > { %v481_v35 = vmul.f32 %v480_v33, %v1742_v25  ;;  %v447_v4 = vadd.f32 %v1728_v13, %v414_v0  ;;  %v417_v6 = vmul.f32 %v1711_v5, %v380_v1  ;;  %v416_v7 = vmul.f32 %v1711_v5, %v379_v2  ;;  %s1469_s21 = scalar_lea.vmem %s2087_s12, 32 }
  0x4f   : > { %510 = vperm.xlu1 %1307, %v436_v26   ;;  %505 = vperm.xlu0 %1306, %v435_v27   ;;  %v419_v10 = vmul.f32 %v1711_v5, %v382_v8  ;;  %v418_v14 = vmul.f32 %v1711_v5, %v381_v9  ;;  %v421_v17 = vmul.f32 %v1711_v5, %v384_v15  ;;  %vm1039_vm2 = vcmp.lt.s32.totalorder %v644_v49, 256  ;;  %p1470_p8 = scmp.ne.s32.totalorder %s2087_s12, %s1469_s21 }
  0x50   : > { %v1759_v40 = vsel %vm477_vm0, %v479_v34, %v481_v35  ;;  %v450_v11 = vadd.f32 %v1728_v13, %v417_v6  ;;  %v449_v12 = vadd.f32 %v1728_v13, %v416_v7  ;;  %v420_v20 = vmul.f32 %v1711_v5, %v383_v16  ;;  %v390_v34 = vld [vmem:[%s1703_s15 + $0xe8] sm:$0xff]  ;;  %v389_v35 = vld [vmem:[%s1703_s15 + $0xe0] sm:$0xff]  ;;  %s1217_s15 = sld [smem:[#allocation3 + $0x5]] }
  0x51   : > { %v452_v18 = vadd.f32 %v1728_v13, %v419_v10  ;;  %v451_v19 = vadd.f32 %v1728_v13, %v418_v14  ;;  %v454_v23 = vadd.f32 %v1728_v13, %v421_v17  ;;  %v423_v26 = vmul.f32 %v1711_v5, %v386_v21  ;;  %p1471_p11 = pnand %p1470_p8, %p2149_p10 }
  0x52   : > { %v453_v24 = vadd.f32 %v1728_v13, %v420_v20  ;;  %v422_v27 = vmul.f32 %v1711_v5, %v385_v22  ;;  %v425_v30 = vmul.f32 %v1711_v5, %v388_v28  ;;  %v424_v33 = vmul.f32 %v1711_v5, %v387_v29 }
  0x53   : > { %520 = vperm.xlu1 %1307, %v438_v37   ;;  %515 = vperm.xlu0 %1306, %v437_v38   ;;  %v456_v31 = vadd.f32 %v1728_v13, %v423_v26  ;;  %v427_v36 = vmul.f32 %v1711_v5, %v390_v34  ;;  %v426_v39 = vmul.f32 %v1711_v5, %v389_v35  ;;  %p1472_p13 = pneg %p1471_p11 }
  0x54   : > { %v455_v32 = vadd.f32 %v1728_v13, %v422_v27  ;;  %v458_v37 = vadd.f32 %v1728_v13, %v425_v30  ;;  %v457_v38 = vadd.f32 %v1728_v13, %v424_v33  ;;  %v428_v46 = vmul.f32 %v1711_v5, %v391_v42 }
  0x55   : > { %v459_v45 = vadd.f32 %v1728_v13, %v426_v39 }
  0x56   : > { %v461_v48 = vadd.f32 %v1728_v13, %v428_v46  ;;  %v465_v53 = vstv %s1217_s15  ;;  %s1562_s15 = smov [#allocation8]  }
  0x57   : > { %530 = vperm.xlu1 %1307, %v440_v43   ;;  %525 = vperm.xlu0 %1306, %v439_v44   ;;  %v429_v43 = vmul.f32 %v1711_v5, %v392_v41  ;;  %v460_v44 = vadd.f32 %v1728_v13, %v427_v36  ;;  %v360_v5 = vld [vmem:[%s337_s25] sm:$0x3] }
  0x59   : > { %v462_v47 = vadd.f32 %v1728_v13, %v429_v43 }
  0x5b   : > { %540 = vperm.xlu1 %1307, %v442_v50   ;;  %535 = vperm.xlu0 %1306, %v441_v51   ;;  %v1830_v50 = vshrl.u32 %v644_v49, 7  ;;  %v463_v51 = vstv %s1216_s8  ;;  %s1043_s8 = scalar_lea.sflag [#allocation4], %s319_s24 }
  0x5c   : > { %v464_v52 = vmul.f32 %v463_v51, %v360_v5 }
  0x5d   : > { %v646_v54 = vsub.s32 0, %v1830_v50  ;;  %v650_v13 = vsub.s32 1, %v1830_v50  ;;  %vm923_vm1 = vcmp.eq.s32.totalorder %v1830_v50, 0 }
  0x5e   : > { %v466_v55 = vadd.f32 %v465_v53, %v464_v52 }
  0x5f   : > { %550 = vperm.xlu1 %1307, %v444_v56   ;;  %545 = vperm.xlu0 %1306, %v443_v57   ;;  %v1843_v61 = vrot.slane %v1742_v25, %v646_v54  ;;  %v1852_v0 = vrot.slane %v1759_v40, %v650_v13 }
  0x60   : > { %v928_v56 = vrot.slane %v466_v55, %v646_v54  ;;  %v932_v57 = vrot.slane %v466_v55, %v650_v13 }
  0x62   : > { %v1840_v58 = vsel %vm923_vm1, %v928_v56, 1.0  ;;  %v936_v59 = vsel %vm923_vm1, %v932_v57, 1.0 }
  0x63   : > { %560 = vperm.xlu1 %1307, %v446_v62   ;;  %555 = vperm.xlu0 %1306, %v445_v63   ;;  %v939_v60 = vpack.c.bf16 %v936_v59, %v936_v59  ;;  %v1846_v62 = vrot.slane %v1742_v25, %v650_v13  ;;  %v1849_v63 = vrot.slane %v1759_v40, %v646_v54 }
  0x65   : > { %1004 = vmatprep.mubr.bf16.mxu0 %v939_v60 }
  0x67   : > { %570 = vperm.xlu1 %1307, %v448_v3   ;;  %565 = vperm.xlu0 %1306, %v447_v4  }
  0x6b   : > { %580 = vperm.xlu1 %1307, %v450_v11   ;;  %575 = vperm.xlu0 %1306, %v449_v12  }
  0x6f   : > { %590 = vperm.xlu1 %1307, %v452_v18   ;;  %585 = vperm.xlu0 %1306, %v451_v19  }
  0x73   : > { %600 = vperm.xlu1 %1307, %v454_v23   ;;  %595 = vperm.xlu0 %1306, %v453_v24  }
  0x77   : > { %610 = vperm.xlu1 %1307, %v456_v31   ;;  %605 = vperm.xlu0 %1306, %v455_v32  }
  0x7b   : > { %620 = vperm.xlu1 %1307, %v458_v37   ;;  %615 = vperm.xlu0 %1306, %v457_v38  }
  0x7f   : > { %630 = vperm.xlu1 %1307, %v460_v44   ;;  %625 = vperm.xlu0 %1306, %v459_v45  }
  0x83   : > { %640 = vperm.xlu1 %1307, %v462_v47   ;;  %635 = vperm.xlu0 %1306, %v461_v48  }
  0xc6   : > { %v496_v1 = vpop.permute.xlu1 %495  ;;  %v486_v2 = vpop.permute.xlu0 %485 }
  0xc7   : > { %v658_v3 = vmul.f32 %v1843_v61, %v496_v1  ;;  %v659_v4 = vmul.f32 %v1846_v62, %v496_v1  ;;  %v654_v6 = vmul.f32 %v1843_v61, %v486_v2  ;;  %v655_v7 = vmul.f32 %v1846_v62, %v486_v2 }
  0xc9   : > { %v733_v8 = vsub.f32 %v658_v3, %v1849_v63  ;;  %v734_v25 = vsub.f32 %v659_v4, %v1852_v0  ;;  %v729_v9 = vsub.f32 %v654_v6, %v1849_v63  ;;  %v730_v10 = vsub.f32 %v655_v7, %v1852_v0 }
  0xca   : > { %v501_v40 = vpop.permute.xlu1 %500  ;;  %v491_v11 = vpop.permute.xlu0 %490 }
  0xcb   : > { %v801_v12 = vmul.f32 1.442695, %v733_v8  ;;  %v803_v14 = vmul.f32 1.442695, %v734_v25  ;;  %v793_v15 = vmul.f32 1.442695, %v729_v9  ;;  %v660_v16 = vmul.f32 %v1843_v61, %v501_v40 }
  0xcc   : > { %v795_v17 = vmul.f32 1.442695, %v730_v10  ;;  %v661_v18 = vmul.f32 %v1846_v62, %v501_v40  ;;  %v656_v19 = vmul.f32 %v1843_v61, %v491_v11  ;;  %v657_v20 = vmul.f32 %v1846_v62, %v491_v11 }
  0xcd   : > { %1308 = vpow2.f32 %v801_v12  ;;  %v735_v21 = vsub.f32 %v660_v16, %v1849_v63 }
  0xce   : > { %1310 = vpow2.f32 %v803_v14  ;;  %v736_v22 = vsub.f32 %v661_v18, %v1852_v0  ;;  %v731_v23 = vsub.f32 %v656_v19, %v1849_v63  ;;  %v732_v24 = vsub.f32 %v657_v20, %v1852_v0  ;;  %v511_v26 = vpop.permute.xlu1 %510  ;;  %v506_v27 = vpop.permute.xlu0 %505 }
  0xcf   : > { %1312 = vpow2.f32 %v793_v15  ;;  %v805_v28 = vmul.f32 1.442695, %v735_v21  ;;  %v664_v29 = vmul.f32 %v1843_v61, %v511_v26  ;;  %v665_v30 = vmul.f32 %v1846_v62, %v511_v26 }
  0xd0   : > { %1314 = vpow2.f32 %v795_v17  ;;  %v807_v31 = vmul.f32 1.442695, %v736_v22  ;;  %v797_v32 = vmul.f32 1.442695, %v731_v23  ;;  %v799_v33 = vmul.f32 1.442695, %v732_v24 }
  0xd1   : > { %1316 = vpow2.f32 %v805_v28  ;;  %v739_v34 = vsub.f32 %v664_v29, %v1849_v63  ;;  %v740_v35 = vsub.f32 %v665_v30, %v1852_v0  ;;  %v662_v36 = vmul.f32 %v1843_v61, %v506_v27 }
  0xd2   : > { %1318 = vpow2.f32 %v807_v31  ;;  %v663_v37 = vmul.f32 %v1846_v62, %v506_v27  ;;  %v521_v38 = vpop.permute.xlu1 %520  ;;  %v516_v39 = vpop.permute.xlu0 %515 }
  0xd3   : > { %1320 = vpow2.f32 %v797_v32  ;;  %v813_v41 = vmul.f32 1.442695, %v739_v34  ;;  %v815_v42 = vmul.f32 1.442695, %v740_v35  ;;  %v737_v43 = vsub.f32 %v662_v36, %v1849_v63 }
  0xd4   : > { %1322 = vpow2.f32 %v799_v33  ;;  %v738_v44 = vsub.f32 %v663_v37, %v1852_v0  ;;  %v668_v45 = vmul.f32 %v1843_v61, %v521_v38  ;;  %v669_v46 = vmul.f32 %v1846_v62, %v521_v38 }
  0xd5   : > { %1324 = vpow2.f32 %v813_v41  ;;  %v809_v47 = vmul.f32 1.442695, %v737_v43  ;;  %v666_v48 = vmul.f32 %v1843_v61, %v516_v39  ;;  %v667_v5 = vmul.f32 %v1846_v62, %v516_v39 }
  0xd6   : > { %1326 = vpow2.f32 %v815_v42  ;;  %v811_v51 = vmul.f32 1.442695, %v738_v44  ;;  %v743_v52 = vsub.f32 %v668_v45, %v1849_v63  ;;  %v744_v53 = vsub.f32 %v669_v46, %v1852_v0  ;;  %v531_v54 = vpop.permute.xlu1 %530  ;;  %v526_v13 = vpop.permute.xlu0 %525 }
  0xd7   : > { %v1884_v55 = vpop.eup %1308  ;;  %1328 = vpow2.f32 %v809_v47  ;;  %v741_v56 = vsub.f32 %v666_v48, %v1849_v63  ;;  %v742_v57 = vsub.f32 %v667_v5, %v1852_v0  ;;  %v672_v59 = vmul.f32 %v1843_v61, %v531_v54 }
  0xd8   : > { %v1889_v60 = vpop.eup %1310  ;;  %1330 = vpow2.f32 %v811_v51  ;;  %v821_v1 = vmul.f32 1.442695, %v743_v52  ;;  %v823_v2 = vmul.f32 1.442695, %v744_v53  ;;  %v673_v3 = vmul.f32 %v1846_v62, %v531_v54 }
  0xd9   : > { %v1892_v4 = vpop.eup %1312  ;;  %v817_v6 = vmul.f32 1.442695, %v741_v56  ;;  %v819_v7 = vmul.f32 1.442695, %v742_v57  ;;  %v747_v8 = vsub.f32 %v672_v59, %v1849_v63  ;;  %v670_v25 = vmul.f32 %v1843_v61, %v526_v13 }
  0xda   : > { %v1315_v9 = vpop.eup %1314  ;;  %1332 = vpow2.f32 %v821_v1  ;;  %v748_v10 = vsub.f32 %v673_v3, %v1852_v0  ;;  %v671_v40 = vmul.f32 %v1846_v62, %v526_v13  ;;  %v541_v11 = vpop.permute.xlu1 %540 }
  0xdb   : > { %v536_v12 = vpop.permute.xlu0 %535  ;;  %v1898_v14 = vpop.eup %1316  ;;  %1334 = vpow2.f32 %v823_v2  ;;  %v829_v15 = vmul.f32 1.442695, %v747_v8  ;;  %v745_v16 = vsub.f32 %v670_v25, %v1849_v63  ;;  %v676_v17 = vmul.f32 %v1843_v61, %v541_v11 }
  0xdc   : > { %v1902_v18 = vpop.eup %1318  ;;  %1336 = vpow2.f32 %v817_v6  ;;  %v831_v19 = vmul.f32 1.442695, %v748_v10  ;;  %v746_v20 = vsub.f32 %v671_v40, %v1852_v0  ;;  %v677_v21 = vmul.f32 %v1846_v62, %v541_v11 }
  0xdd   : > { %v1321_v22 = vpop.eup %1320  ;;  %1338 = vpow2.f32 %v819_v7  ;;  %v825_v23 = vmul.f32 1.442695, %v745_v16  ;;  %v751_v24 = vsub.f32 %v676_v17, %v1849_v63  ;;  %v674_v26 = vmul.f32 %v1843_v61, %v536_v12 }
  0xde   : > { %v1323_v27 = vpop.eup %1322  ;;  %1340 = vpow2.f32 %v829_v15  ;;  %v827_v28 = vmul.f32 1.442695, %v746_v20  ;;  %v752_v29 = vsub.f32 %v677_v21, %v1852_v0  ;;  %v675_v30 = vmul.f32 %v1846_v62, %v536_v12  ;;  %v551_v31 = vpop.permute.xlu1 %550 }
  0xdf   : > { %v546_v32 = vpop.permute.xlu0 %545  ;;  %v1910_v33 = vpop.eup %1324  ;;  %1342 = vpow2.f32 %v831_v19  ;;  %v837_v34 = vmul.f32 1.442695, %v751_v24  ;;  %v749_v35 = vsub.f32 %v674_v26, %v1849_v63  ;;  %v680_v36 = vmul.f32 %v1843_v61, %v551_v31 }
  0xe0   : > { %v1914_v37 = vpop.eup %1326  ;;  %1344 = vpow2.f32 %v825_v23  ;;  %v839_v38 = vmul.f32 1.442695, %v752_v29  ;;  %v750_v39 = vsub.f32 %v675_v30, %v1852_v0  ;;  %v681_v41 = vmul.f32 %v1846_v62, %v551_v31 }
  0xe1   : > { %v1918_v42 = vpop.eup %1328  ;;  %1346 = vpow2.f32 %v827_v28  ;;  %v833_v43 = vmul.f32 1.442695, %v749_v35  ;;  %v755_v44 = vsub.f32 %v680_v36, %v1849_v63  ;;  %v678_v45 = vmul.f32 %v1843_v61, %v546_v32 }
  0xe2   : > { %v1331_v46 = vpop.eup %1330  ;;  %1348 = vpow2.f32 %v837_v34  ;;  %v835_v47 = vmul.f32 1.442695, %v750_v39  ;;  %v756_v48 = vsub.f32 %v681_v41, %v1852_v0  ;;  %v679_v5 = vmul.f32 %v1846_v62, %v546_v32  ;;  %v561_v51 = vpop.permute.xlu1 %560 }
  0xe3   : > { %v556_v52 = vpop.permute.xlu0 %555  ;;  %1350 = vpow2.f32 %v839_v38  ;;  %v845_v53 = vmul.f32 1.442695, %v755_v44  ;;  %v753_v54 = vsub.f32 %v678_v45, %v1849_v63  ;;  %v941_v13 = vpack.c.bf16 %v1323_v27, %v1315_v9 }
  0xe4   : > { %v1925_v56 = vpop.eup %1332  ;;  %1352 = vpow2.f32 %v833_v43  ;;  %v847_v57 = vmul.f32 1.442695, %v756_v48  ;;  %v754_v59 = vsub.f32 %v679_v5, %v1852_v0  ;;  %v940_v1 = vpack.c.bf16 %v1321_v22, %v1892_v4 }
  0xe5   : > { %v1929_v2 = vpop.eup %1334  ;;  %1354 = vpow2.f32 %v835_v47  ;;  %v841_v3 = vmul.f32 1.442695, %v753_v54  ;;  %972 = vmatprep.subr.bf16.mxu0 %v941_v13  ;;  %v943_v6 = vpack.c.bf16 %v1902_v18, %v1889_v60  ;;  %v684_v7 = vmul.f32 %v1843_v61, %v561_v51 }
  0xe6   : > { %v1934_v8 = vpop.eup %1336  ;;  %1356 = vpow2.f32 %v845_v53  ;;  %v843_v25 = vmul.f32 1.442695, %v754_v59  ;;  %973 = vmatpush1.bf16.msra.mxu0 %v940_v1  ;;  %v685_v9 = vmul.f32 %v1846_v62, %v561_v51  ;;  %v682_v10 = vmul.f32 %v1843_v61, %v556_v52  ;;  %v571_v4 = vpop.permute.xlu1 %570 }
  0xe7   : > { %v566_v40 = vpop.permute.xlu0 %565  ;;  %v1339_v11 = vpop.eup %1338  ;;  %1358 = vpow2.f32 %v847_v57  ;;  %974 = vmatprep.subr.bf16.mxu0 %v943_v6  ;;  %v759_v12 = vsub.f32 %v684_v7, %v1849_v63  ;;  %v683_v60 = vmul.f32 %v1846_v62, %v556_v52  ;;  %v942_v15 = vpack.c.bf16 %v1898_v14, %v1884_v55 }
  0xe8   : > { %v1942_v16 = vpop.eup %1340  ;;  %1360 = vpow2.f32 %v841_v3  ;;  %v760_v17 = vsub.f32 %v685_v9, %v1852_v0  ;;  %v757_v18 = vsub.f32 %v682_v10, %v1849_v63  ;;  %v945_v19 = vpack.c.bf16 %v1914_v37, %v1331_v46 }
  0xe9   : > { %v1947_v20 = vpop.eup %1342  ;;  %1362 = vpow2.f32 %v843_v25  ;;  %v853_v21 = vmul.f32 1.442695, %v759_v12  ;;  %v758_v22 = vsub.f32 %v683_v60, %v1852_v0  ;;  %v688_v23 = vmul.f32 %v1843_v61, %v571_v4 }
  0xea   : > { %v1951_v24 = vpop.eup %1344  ;;  %v855_v55 = vmul.f32 1.442695, %v760_v17  ;;  %v849_v14 = vmul.f32 1.442695, %v757_v18  ;;  %975 = vmatpush1.bf16.msra.mxu0 %v942_v15  ;;  %v689_v26 = vmul.f32 %v1846_v62, %v571_v4  ;;  %v686_v27 = vmul.f32 %v1843_v61, %v566_v40  ;;  %v581_v28 = vpop.permute.xlu1 %580 }
  0xeb   : > { %v576_v29 = vpop.permute.xlu0 %575  ;;  %v1347_v30 = vpop.eup %1346  ;;  %1364 = vpow2.f32 %v853_v21  ;;  %v851_v31 = vmul.f32 1.442695, %v758_v22  ;;  %976 = vmatprep.subr.bf16.mxu0 %v945_v19  ;;  %v763_v32 = vsub.f32 %v688_v23, %v1849_v63  ;;  %v687_v34 = vmul.f32 %v1846_v62, %v566_v40 }
  0xec   : > { %v1957_v35 = vpop.eup %1348  ;;  %1366 = vpow2.f32 %v855_v55  ;;  %v764_v36 = vsub.f32 %v689_v26, %v1852_v0  ;;  %v761_v37 = vsub.f32 %v686_v27, %v1849_v63  ;;  %v944_v38 = vpack.c.bf16 %v1910_v33, %v1918_v42 }
  0xed   : > { %v1963_v39 = vpop.eup %1350  ;;  %1368 = vpow2.f32 %v849_v14  ;;  %v861_v41 = vmul.f32 1.442695, %v763_v32  ;;  %v762_v43 = vsub.f32 %v687_v34, %v1852_v0  ;;  %v947_v44 = vpack.c.bf16 %v1929_v2, %v1339_v11 }
  0xee   : > { %v1967_v45 = vpop.eup %1352  ;;  %1370 = vpow2.f32 %v851_v31  ;;  %v863_v46 = vmul.f32 1.442695, %v764_v36  ;;  %v857_v47 = vmul.f32 1.442695, %v761_v37  ;;  %977 = vmatpush1.bf16.msra.mxu0 %v944_v38  ;;  %v692_v48 = vmul.f32 %v1843_v61, %v581_v28  ;;  %v591_v5 = vpop.permute.xlu1 %590 }
  0xef   : > { %v586_v51 = vpop.permute.xlu0 %585  ;;  %v1355_v52 = vpop.eup %1354  ;;  %1372 = vpow2.f32 %v861_v41  ;;  %v859_v33 = vmul.f32 1.442695, %v762_v43  ;;  %978 = vmatprep.subr.bf16.mxu0 %v947_v44  ;;  %v693_v42 = vmul.f32 %v1846_v62, %v581_v28  ;;  %v690_v53 = vmul.f32 %v1843_v61, %v576_v29 }
  0xf0   : > { %v1972_v54 = vpop.eup %1356  ;;  %1374 = vpow2.f32 %v863_v46  ;;  %v767_v13 = vsub.f32 %v692_v48, %v1849_v63  ;;  %v691_v57 = vmul.f32 %v1846_v62, %v576_v29  ;;  %v946_v59 = vpack.c.bf16 %v1925_v56, %v1934_v8 }
  0xf1   : > { %v1978_v1 = vpop.eup %1358  ;;  %1376 = vpow2.f32 %v857_v47  ;;  %v768_v2 = vsub.f32 %v693_v42, %v1852_v0  ;;  %v765_v3 = vsub.f32 %v690_v53, %v1849_v63  ;;  %v949_v6 = vpack.c.bf16 %v1947_v20, %v1347_v30 }
  0xf2   : > { %v1983_v7 = vpop.eup %1360  ;;  %1378 = vpow2.f32 %v859_v33  ;;  %v869_v25 = vmul.f32 1.442695, %v767_v13  ;;  %v766_v9 = vsub.f32 %v691_v57, %v1852_v0  ;;  %979 = vmatpush1.bf16.msra.mxu0 %v946_v59  ;;  %v696_v10 = vmul.f32 %v1843_v61, %v591_v5  ;;  %v601_v4 = vpop.permute.xlu1 %600 }
  0xf3   : > { %v596_v56 = vpop.permute.xlu0 %595  ;;  %v1363_v8 = vpop.eup %1362  ;;  %v871_v40 = vmul.f32 1.442695, %v768_v2  ;;  %v865_v11 = vmul.f32 1.442695, %v765_v3  ;;  %980 = vmatprep.subr.bf16.mxu0 %v949_v6  ;;  %v697_v12 = vmul.f32 %v1846_v62, %v591_v5  ;;  %v694_v60 = vmul.f32 %v1843_v61, %v586_v51 }
  0xf4   : > { %1380 = vpow2.f32 %v869_v25  ;;  %v867_v15 = vmul.f32 1.442695, %v766_v9  ;;  %v771_v17 = vsub.f32 %v696_v10, %v1849_v63  ;;  %v695_v18 = vmul.f32 %v1846_v62, %v586_v51 }
  0xf5   : > { %v1991_v19 = vpop.eup %1364  ;;  %1382 = vpow2.f32 %v871_v40  ;;  %v772_v20 = vsub.f32 %v697_v12, %v1852_v0  ;;  %v769_v21 = vsub.f32 %v694_v60, %v1849_v63  ;;  %v948_v22 = vpack.c.bf16 %v1942_v16, %v1951_v24 }
  0xf6   : > { %v1997_v23 = vpop.eup %1366  ;;  %1384 = vpow2.f32 %v865_v11  ;;  %v877_v55 = vmul.f32 1.442695, %v771_v17  ;;  %v770_v14 = vsub.f32 %v695_v18, %v1852_v0  ;;  %v951_v26 = vpack.c.bf16 %v1963_v39, %v1355_v52  ;;  %v611_v27 = vpop.permute.xlu1 %610 }
  0xf7   : > { %v606_v28 = vpop.permute.xlu0 %605  ;;  %v2001_v29 = vpop.eup %1368  ;;  %1386 = vpow2.f32 %v867_v15  ;;  %v879_v30 = vmul.f32 1.442695, %v772_v20  ;;  %v873_v31 = vmul.f32 1.442695, %v769_v21  ;;  %981 = vmatpush1.bf16.msra.mxu0 %v948_v22  ;;  %v700_v32 = vmul.f32 %v1843_v61, %v601_v4 }
  0xf8   : > { %v1371_v34 = vpop.eup %1370  ;;  %1388 = vpow2.f32 %v877_v55  ;;  %v875_v16 = vmul.f32 1.442695, %v770_v14  ;;  %982 = vmatprep.subr.bf16.mxu0 %v951_v26  ;;  %v701_v24 = vmul.f32 %v1846_v62, %v601_v4  ;;  %v698_v36 = vmul.f32 %v1843_v61, %v596_v56 }
  0xf9   : > { %v2006_v37 = vpop.eup %1372  ;;  %1390 = vpow2.f32 %v879_v30  ;;  %v775_v38 = vsub.f32 %v700_v32, %v1849_v63  ;;  %v699_v39 = vmul.f32 %v1846_v62, %v596_v56  ;;  %v950_v41 = vpack.c.bf16 %v1957_v35, %v1967_v45 }
  0xfa   : > { %v2012_v43 = vpop.eup %1374  ;;  %1392 = vpow2.f32 %v873_v31  ;;  %v776_v44 = vsub.f32 %v701_v24, %v1852_v0  ;;  %v773_v46 = vsub.f32 %v698_v36, %v1849_v63  ;;  %v953_v47 = vpack.c.bf16 %v1978_v1, %v1363_v8  ;;  %v621_v48 = vpop.permute.xlu1 %620 }
  0xfb   : > { %v2017_v5 = vpop.eup %1376  ;;  %1394 = vpow2.f32 %v875_v16  ;;  %v885_v51 = vmul.f32 1.442695, %v775_v38  ;;  %v774_v52 = vsub.f32 %v699_v39, %v1852_v0  ;;  %983 = vmatpush1.bf16.msra.mxu0 %v950_v41  ;;  %v704_v33 = vmul.f32 %v1843_v61, %v611_v27  ;;  %v616_v35 = vpop.permute.xlu0 %615 }
  0xfc   : > { %v1379_v45 = vpop.eup %1378  ;;  %v887_v42 = vmul.f32 1.442695, %v776_v44  ;;  %v881_v53 = vmul.f32 1.442695, %v773_v46  ;;  %984 = vmatprep.subr.bf16.mxu0 %v953_v47  ;;  %v705_v13 = vmul.f32 %v1846_v62, %v611_v27  ;;  %v702_v57 = vmul.f32 %v1843_v61, %v606_v28 }
  0xfd   : > { %1396 = vpow2.f32 %v885_v51  ;;  %v883_v59 = vmul.f32 1.442695, %v774_v52  ;;  %v779_v1 = vsub.f32 %v704_v33, %v1849_v63  ;;  %v703_v2 = vmul.f32 %v1846_v62, %v606_v28 }
  0xfe   : > { %v2025_v3 = vpop.eup %1380  ;;  %1398 = vpow2.f32 %v887_v42  ;;  %v780_v6 = vsub.f32 %v705_v13, %v1852_v0  ;;  %v777_v25 = vsub.f32 %v702_v57, %v1849_v63  ;;  %v952_v9 = vpack.c.bf16 %v1972_v54, %v1983_v7  ;;  %v631_v15 = vpop.permute.xlu1 %630 }
  0xff   : > { %v2031_v10 = vpop.eup %1382  ;;  %1400 = vpow2.f32 %v881_v53  ;;  %v893_v4 = vmul.f32 1.442695, %v779_v1  ;;  %v778_v56 = vsub.f32 %v703_v2, %v1852_v0  ;;  %v955_v8 = vpack.c.bf16 %v1997_v23, %v1371_v34  ;;  %v626_v18 = vpop.permute.xlu0 %625 }
 0x100   : > { %v2035_v40 = vpop.eup %1384  ;;  %1402 = vpow2.f32 %v883_v59  ;;  %v895_v11 = vmul.f32 1.442695, %v780_v6  ;;  %v889_v12 = vmul.f32 1.442695, %v777_v25  ;;  %985 = vmatpush1.bf16.msra.mxu0 %v952_v9  ;;  %v708_v60 = vmul.f32 %v1843_v61, %v621_v48 }
 0x101   : > { %v1387_v17 = vpop.eup %1386  ;;  %1404 = vpow2.f32 %v893_v4  ;;  %986 = vmatprep.subr.bf16.mxu0 %v955_v8  ;;  %v709_v54 = vmul.f32 %v1846_v62, %v621_v48  ;;  %v706_v7 = vmul.f32 %v1843_v61, %v616_v35  ;;  %v891_v21 = vmul.f32 1.442695, %v778_v56 }
 0x102   : > { %v2040_v20 = vpop.eup %1388  ;;  %v783_v22 = vsub.f32 %v708_v60, %v1849_v63  ;;  %v707_v23 = vmul.f32 %v1846_v62, %v616_v35  ;;  %v954_v55 = vpack.c.bf16 %v1991_v19, %v2001_v29  ;;  %1406 = vpow2.f32 %v895_v11 }
 0x103   : > { %v1391_v14 = vpop.eup %1390  ;;  %v784_v26 = vsub.f32 %v709_v54, %v1852_v0  ;;  %v781_v27 = vsub.f32 %v706_v7, %v1849_v63  ;;  %v957_v28 = vpack.c.bf16 %v2012_v43, %v1379_v45  ;;  %1408 = vpow2.f32 %v889_v12  ;;  %v641_v43 = vpop.permute.xlu1 %640 }
 0x104   : > { %v2049_v30 = vpop.eup %1392  ;;  %v901_v31 = vmul.f32 1.442695, %v783_v22  ;;  %v782_v32 = vsub.f32 %v707_v23, %v1852_v0  ;;  %987 = vmatpush1.bf16.msra.mxu0 %v954_v55  ;;  %v712_v34 = vmul.f32 %v1843_v61, %v631_v15  ;;  %v713_v29 = vmul.f32 %v1846_v62, %v631_v15  ;;  %v636_v51 = vpop.permute.xlu0 %635 }
 0x105   : > { %v1395_v16 = vpop.eup %1394  ;;  %v903_v24 = vmul.f32 1.442695, %v784_v26  ;;  %v897_v19 = vmul.f32 1.442695, %v781_v27  ;;  %988 = vmatprep.subr.bf16.mxu0 %v957_v28  ;;  %v710_v36 = vmul.f32 %v1843_v61, %v626_v18  ;;  %1410 = vpow2.f32 %v891_v21 }
 0x106   : > { %v899_v38 = vmul.f32 1.442695, %v782_v32  ;;  %v787_v39 = vsub.f32 %v712_v34, %v1849_v63  ;;  %v711_v41 = vmul.f32 %v1846_v62, %v626_v18  ;;  %1412 = vpow2.f32 %v901_v31 }
 0x107   : > { %v1397_v44 = vpop.eup %1396  ;;  %v788_v46 = vsub.f32 %v713_v29, %v1852_v0  ;;  %v785_v47 = vsub.f32 %v710_v36, %v1849_v63  ;;  %v956_v48 = vpack.c.bf16 %v2006_v37, %v2017_v5  ;;  %1414 = vpow2.f32 %v903_v24 }
 0x108   : > { %v1399_v52 = vpop.eup %1398  ;;  %v909_v33 = vmul.f32 1.442695, %v787_v39  ;;  %v786_v35 = vsub.f32 %v711_v41, %v1852_v0  ;;  %v959_v45 = vpack.c.bf16 %v2031_v10, %v1387_v17  ;;  %1416 = vpow2.f32 %v897_v19 }
 0x109   : > { %v1401_v42 = vpop.eup %1400  ;;  %v911_v53 = vmul.f32 1.442695, %v788_v46  ;;  %989 = vmatpush1.bf16.msra.mxu0 %v956_v48  ;;  %v716_v13 = vmul.f32 %v1843_v61, %v641_v43  ;;  %1418 = vpow2.f32 %v899_v38  ;;  %v717_v37 = vmul.f32 %v1846_v62, %v641_v43 }
 0x10a   : > { %v1403_v57 = vpop.eup %1402  ;;  %v907_v59 = vmul.f32 1.442695, %v786_v35  ;;  %990 = vmatprep.subr.bf16.mxu0 %v959_v45  ;;  %v714_v5 = vmul.f32 %v1843_v61, %v636_v51  ;;  %v905_v2 = vmul.f32 1.442695, %v785_v47  ;;  %v715_v25 = vmul.f32 %v1846_v62, %v636_v51 }
 0x10b   : > { %v1405_v1 = vpop.eup %1404  ;;  %v791_v6 = vsub.f32 %v716_v13, %v1849_v63  ;;  %v958_v9 = vpack.c.bf16 %v2025_v3, %v2035_v40  ;;  %1420 = vpow2.f32 %v909_v33  ;;  %v792_v10 = vsub.f32 %v717_v37, %v1852_v0 }
 0x10c   : > { %v789_v4 = vsub.f32 %v714_v5, %v1849_v63  ;;  %v961_v56 = vpack.c.bf16 %v1391_v14, %v1395_v16  ;;  %v1407_v8 = vpop.eup %1406  ;;  %1422 = vpow2.f32 %v911_v53  ;;  %v790_v61 = vsub.f32 %v715_v25, %v1852_v0 }
 0x10d   : > { %v917_v11 = vmul.f32 1.442695, %v791_v6  ;;  %991 = vmatpush1.bf16.msra.mxu0 %v958_v9  ;;  %v1409_v12 = vpop.eup %1408  ;;  %1424 = vpow2.f32 %v907_v59  ;;  %v919_v60 = vmul.f32 1.442695, %v792_v10  ;;  %v960_v3 = vpack.c.bf16 %v2040_v20, %v2049_v30 }
 0x10e   : > { %v913_v15 = vmul.f32 1.442695, %v789_v4  ;;  %992 = vmatprep.subr.bf16.mxu0 %v961_v56  ;;  %v915_v62 = vmul.f32 1.442695, %v790_v61  ;;  %v963_v63 = vpack.c.bf16 %v1399_v52, %v1403_v57  ;;  %v962_v7 = vpack.c.bf16 %v1397_v44, %v1401_v42  ;;  %v1438_v57 = vld [vmem:[%s1718_s13] sm:$0x3] }
 0x10f   : > { %1426 = vpow2.f32 %v917_v11  ;;  %v1411_v40 = vpop.eup %1410  ;;  %v964_v55 = vpack.c.bf16 %v1405_v1, %v1409_v12  ;;  %v938_v29 = vpack.c.bf16 %v1840_v58, %v1840_v58  ;;  %v1560_v36 = vmov 0.0   ;;  %s1473_s13 = sshll.u32 %s1562_s15, 4  ;;  %s1474_s13 = int_to_ptr.vmem [resolvable:$false] %s1473_s13 }
 0x110   : > { %1428 = vpow2.f32 %v905_v2  ;;  %v1413_v17 = vpop.eup %1412  ;;  %v965_v21 = vpack.c.bf16 %v1407_v8, %v1411_v40  ;;  %358 = vst [vmem:[#allocation2] sm:$0xf] %v1560_v36  ;;  %v1561_v38 = vmov 1983009808   ;;  %v1034_v53 = vstv %s1218_s9  ;;  %s1475_s16 = scalar_lea.vmem %s1474_s13, 64  ;;  %p1476_p1 = scmp.lt.s32.totalorder %s2087_s12, %s1474_s13 }
 0x111   : > { %1430 = vpow2.f32 %v913_v15  ;;  %993 = vmatpush1.bf16.msra.mxu0 %v960_v3  ;;  %v1415_v54 = vpop.eup %1414  ;;  %v1017_v39 = vunpack.c.l.s4 %v1561_v38  ;;  %p1477_p6 = scmp.lt.s32.totalorder %s1475_s16, %s1469_s21 }
 0x112   : > { %1432 = vpow2.f32 %v919_v60  ;;  %994 = vmatprep.subr.bf16.mxu0 %v963_v63  ;;  %v1417_v0 = vpop.eup %1416 }
 0x113   : > { %1434 = vpow2.f32 %v915_v62  ;;  %v1419_v18 = vpop.eup %1418  ;;  %v966_v30 = vpack.c.bf16 %v1413_v17, %v1417_v0  ;;  %v1018_v41 = vunpack.c.0.s8 %v1017_v39  ;;  %p1478_p7 = por %p1477_p6, %p1476_p1 }
 0x114   : > { %v967_v14 = vpack.c.bf16 %v1415_v54, %v1419_v18 }
 0x115   : > { %995 = vmatpush1.bf16.msra.mxu0 %v962_v7  ;;  %v1421_v22 = vpop.eup %1420  ;;  %v1021_v44 = vsub.s32 %v1018_v41, %v1830_v50  ;;  %p1479_p9 = pnand %p1478_p7, %p1472_p13 }
 0x116   : > { %996 = vmatprep.subr.bf16.mxu0 %v965_v21  ;;  %v1423_v23 = vpop.eup %1422 }
 0x117   : > { %v1425_v20 = vpop.eup %1424  ;;  %v937_v51 = vld [vmem:[#allocation2] sm:$0xf] }
 0x118   : > { %v969_v32 = vpack.c.bf16 %v1423_v23, %v1425_v20 }
 0x119   : > { %v1427_v26 = vpop.eup %1426  ;;  %997 = vmatpush1.bf16.msra.mxu0 %v964_v55 }
 0x11a   : > { %v1429_v27 = vpop.eup %1428  ;;  %998 = vmatprep.subr.bf16.mxu0 %v967_v14 }
 0x11b   : > { %v1431_v28 = vpop.eup %1430  ;;  %v968_v24 = vpack.c.bf16 %v1421_v22, %v1429_v27 }
 0x11c   : > { %v1433_v31 = vpop.eup %1432  ;;  %v970_v34 = vpack.c.bf16 %v1427_v26, %v1431_v28 }
 0x11d   : > { %v1435_v16 = vpop.eup %1434  ;;  %999 = vmatpush1.bf16.msra.mxu0 %v966_v30 }
 0x11e   : > { %1000 = vmatprep.subr.bf16.mxu0 %v969_v32  ;;  %v971_v19 = vpack.c.bf16 %v1433_v31, %v1435_v16 }
 0x121   : > { %1001 = vmatpush1.bf16.msra.mxu0 %v968_v24 }
 0x122   : > { %1002 = vmatprep.subr.bf16.mxu0 %v971_v19 }
 0x125   : > { %1003 = vmatpush1.bf16.msra.mxu0 %v970_v34 }
 0x128   : > { %1005 = vmatmul.mubr.bf16.vlgmr.msra.gmra.mrb[0].mxu0 %v938_v29 }
 0x1fb   : > { %v1006_v43 = vpop.f32.mrb[0].mxu0 }
 0x1fc   : > { %v1008_v46 = vpop.f32.mrb[1].mxu0 }
 0x1fd   : > { %v1015_v47 = vcombine.low %v1006_v43, %v1008_v46  ;;  %v1010_v48 = vpop.f32.mrb[2].mxu0 }
 0x1fe   : > { %v1011_v52 = vpop.f32.mrb[3].mxu0 }
 0x1ff   : > { %v1022_v33 = vrot.slane %v1015_v47, %v1021_v44 }
 0x201   : > { %v1024_v35 = vadd.f32 %v1022_v33, %v937_v51 }
 0x203   : > { %1025 = vst [vmem:[#allocation2] sm:$0xf] %v1024_v35 }
 0x20a   : > { %v1031_v58 = vld [vmem:[#allocation2 + $0x1] ss:$2 sm:$0x3]  ;;  %v1029_v42 = vld [vmem:[#allocation2] ss:$2 sm:$0x3] }
 0x20b   : > { %1436 = vrcp.f32 %v1031_v58 }
 0x215   : > { %v1437_v45 = vpop.eup %1436 }
 0x216   : > { %v1033_v50 = vmul.f32 %v1437_v45, %v1029_v42 }
 0x218   : > { %v1035_v13 = vmul.f32 %v1034_v53, %v1033_v50 }
 0x21a   : > { %v1036_v59 = vadd.f32 %v1438_v57, %v1035_v13 }
 0x21c   : > { %1041 = vst.msk [vmem:[%s321_s10] sm:$0x3] %vm1039_vm2, %v1036_v59 }
 0x21d   : > { %1482 = shalt.err (!%p1479_p9)
}
 0x21e   : > { %s1483_s17 = scalar_lea.hbm %s2085_s7, 32  ;;  %s1487_s24 = scalar_lea.hbm %s2137_s5, 64 }
 0x21f   : > { %p1484_p12 = scmp.ne.s32.totalorder %s2085_s7, %s1483_s17  ;;  %p1488_p3 = scmp.lt.u32.totalorder %s2085_s7, %s2137_s5 }
 0x220   : > { %p1489_p5 = scmp.lt.u32.totalorder %s1487_s24, %s1483_s17  ;;  %p1491_p8 = scmp.lt.u32.totalorder %s1483_s17, %s2085_s7 }
 0x221   : > { %p1485_p0 = pnand %p1484_p12, %p2149_p10 }
 0x222   : > { %p1490_p4 = por %p1489_p5, %p1488_p3 }
 0x223   : > { %p1486_p2 = pneg %p1485_p0 }
 0x224   : > { %p1492_p11 = por %p1491_p8, %p1490_p4 }
 0x226   : > { %p1493_p13 = pnand %p1492_p11, %p1486_p2 }
 0x228   : > { %1496 = shalt.err (!%p1493_p13)
}
 0x229   : > { %1235 = dma.vmem_to_hbm [thread:$0]  (%p2149_p10), %s2087_s12, 32, %s2085_s7, %s1043_s8  }
 0x22a PF: > { %p1252_p1 = scmp.ge.s32.totalorder %s1555_s23, 2  ;;  %s1071_s10 = sand.u32 1, %s1535_s18  }
 0x22b   : > { %p2150_p6 = scmp.ne.s32.totalorder %s2143_s30, 0  ;;  %s1072_s14 = scalar_lea.sflag [#allocation4], %s1071_s10 }
 0x22d   : > { %p1245_p7 = pnand %p1252_p1, %p2150_p6 }
 0x22f   : > { %1530 = dma.done.wait (!%p1245_p7), %s1072_s14, 32  }
 0x230   : > { %1532 = vsyncadd (!%p1245_p7), %s1072_s14, 4294967264  ;;  %s20_s23 = sadd.s32 1, %s1555_s23   ;;  %s2151_s18 = smov %s1539_s19 }
 0x231   : > { %p17_p9 = scmp.ge.s32.totalorder %s20_s23, 4   ;;  %s2152_s19 = smov %s1543_s20 }
 0x232   : > { %s2153_s20 = smov %s1646_s6  ;;  %s2154_s21 = smov %s1551_s22 }
 0x233   : > { %s2155_s22 = smov %s2157_s26  ;;  %19 = sbr.rel (!%p17_p9) target bundleno = 6 (0x6), region = 99 }
 0x23a   :  { %1077 = vsyncpa [#allocation4], 1 }
 0x23b   :  { %1079 = vsyncpa [#allocation4 + $0x1], 1 }
 0x23c   :  { %1080 = vsyncpa [#allocation5], 1 }
 0x23d   :  { %1082 = vsyncpa [#allocation5 + $0x1], 1 }
 0x23e   :  { %1083 = vsyncpa [#allocation7], 1 }

</bundles_post_ra>
